<compile_context>
chip_gen: v7x
topology: tpu7x:2x2x1
jax: 0.10.0
libtpu: 0.0.40
codegen_flags: <defaults>
</compile_context>

<pallas_src>
import functools

import jax
import jax.numpy as jnp
from jax import lax
from jax.experimental import pallas as pl
from jax.experimental.pallas import tpu as pltpu

LANES = 128


def _prep_kernel(labels_ref, logits_ref, nll_ref, score_ref, psum_ref, pcnt_ref,
                 *, num_classes):
    """Per-pixel NLL + background softmax score + per-tile positive partials.

    Blocks: labels (1,R,128) int32, logits (1,C,R,128); everything per-pixel is a
    dense (R,128) full-vreg tile.
    """
    labels = labels_ref[0]                               # (R, 128) int32
    x0 = logits_ref[0, 0].astype(jnp.float32)            # (R, 128)

    # max over channels: short unrolled loop of dense (R,128) VPU maxes.
    m = x0
    for c in range(1, num_classes):
        m = jnp.maximum(m, logits_ref[0, c].astype(jnp.float32))

    ex0 = jnp.exp(x0 - m)
    denom = ex0
    sel = x0                                             # logit of the true class
    for c in range(1, num_classes):
        xc = logits_ref[0, c].astype(jnp.float32)
        denom = denom + jnp.exp(xc - m)
        sel = jnp.where(labels == c, xc, sel)

    nll = jnp.log(denom) - (sel - m)                     # -log_softmax at the label
    nll_ref[0] = nll
    # Exact division so the ranking key matches jax.nn.softmax bit-for-bit
    # (pl.reciprocal(approx=True) could perturb near-tie OHEM selections).
    score_ref[0] = ex0 / denom                           # softmax prob of class 0

    # Per-tile positive partials (lets kernel 2 skip the labels stream entirely).
    posf = (labels > 0).astype(jnp.float32)
    pos_sum = jnp.sum(nll * posf)
    pos_cnt = jnp.sum((labels > 0).astype(jnp.int32))
    psum_ref[0, 0] = jnp.full((8, LANES), pos_sum, jnp.float32)
    pcnt_ref[0, 0] = jnp.full((8, LANES), pos_cnt, jnp.int32)


def _select_kernel(num_neg_ref, score_ref, nll_ref, out_ref, *,
                   hw, key_iters, idx_iters):
    """Per-batch OHEM negative selection -> (neg_sum, neg_cnt) partials."""
    b = pl.program_id(0)
    num_neg = num_neg_ref[b]                             # int32 scalar (prefetched)

    score = score_ref[0]                                 # (rows, 128) f32 in [0,1]
    rows, lanes = score.shape

    # Non-negative f32 -> int32 bit pattern preserves ordering.
    key = pltpu.bitcast(score, jnp.int32)
    idx = (lax.broadcasted_iota(jnp.int32, (rows, lanes), 0) * lanes
           + lax.broadcasted_iota(jnp.int32, (rows, lanes), 1))   # flat pixel index
    if rows * lanes != hw:                               # mask lane padding
        key = jnp.where(idx < hw, key, -1)

    # Largest integer threshold T with count(key >= T) >= num_neg:
    # T is then exactly the num_neg-th largest key.  ~30 dense passes.
    def _key_body(_, carry):
        lo, hi = carry
        mid = (lo + hi) // 2
        cnt = jnp.sum((key >= mid).astype(jnp.int32))
        ge = cnt >= num_neg
        return jnp.where(ge, mid, lo), jnp.where(ge, hi, mid)

    t_key, _ = lax.fori_loop(0, key_iters, _key_body,
                             (jnp.int32(0), jnp.int32(1 << 30)))

    n_gt = jnp.sum((key > t_key).astype(jnp.int32))
    tie = key == t_key
    tie_budget = num_neg - n_gt                          # tied pixels to admit

    # Admit tied pixels in ascending pixel index (stable-argsort tie-break):
    # smallest cut I with count(tie & idx < I) >= tie_budget.
    def _idx_body(_, carry):
        lo, hi = carry
        mid = (lo + hi) // 2
        cnt = jnp.sum((tie & (idx < mid)).astype(jnp.int32))
        ge = cnt >= tie_budget
        return jnp.where(ge, lo, mid), jnp.where(ge, mid, hi)

    _, idx_cut = lax.fori_loop(0, idx_iters, _idx_body,
                               (jnp.int32(0), jnp.int32(hw)))

    neg = (key > t_key) | (tie & (idx < idx_cut) & (tie_budget > 0))
    neg = jnp.logical_and(neg, num_neg > 0)
    negf = neg.astype(jnp.float32)

    nll = nll_ref[0]                                     # load late (liveness)
    out_ref[0, 0] = jnp.full((8, LANES), jnp.sum(nll * negf), jnp.float32)
    out_ref[0, 1] = jnp.full((8, LANES), jnp.sum(negf), jnp.float32)


def _pick_tile_rows(rows_total, num_classes, itemsize):
    """Rows of 128 pixels per prep block: big (16K-64K px), VMEM-safe, (8,128)-legal."""
    bytes_per_row = num_classes * LANES * max(itemsize, 4)
    cap = min(rows_total, 512, max(1, (4 * 1024 * 1024) // bytes_per_row))
    for r in range(cap, 0, -1):
        if rows_total % r == 0 and (r % 8 == 0 or r == rows_total):
            return r
    # TODO(synk): rows_total has no multiple-of-8 divisor <= cap; fall back to a
    # full per-batch row per grid step (fine for typical segmentation shapes).
    return rows_total


def segmentation_ohem_loss(y_true, y_pred, neg_pos=3):
    """y_true: (B, H, W) integer labels; y_pred: (B, C, H, W) logits (NCHW)."""
    B, C, H, W = y_pred.shape
    HW = H * W
    rows_total = -(-HW // LANES)          # cdiv
    hw_pad = rows_total * LANES

    # No NHWC transpose: channels stay on a tiny leading axis; pixels fill dense
    # (rows, 128) sublane x lane tiles.  Pure reshapes (+ cheap pad if needed).
    logits_flat = y_pred.reshape(B, C, HW)
    labels_flat = y_true.reshape(B, HW).astype(jnp.int32)
    if hw_pad != HW:
        pad = hw_pad - HW
        logits_flat = jnp.pad(logits_flat, ((0, 0), (0, 0), (0, pad)))
        labels_flat = jnp.pad(labels_flat, ((0, 0), (0, pad)))   # pad labels = 0
    logits = logits_flat.reshape(B, C, rows_total, LANES)
    labels = labels_flat.reshape(B, rows_total, LANES)

    tile_rows = _pick_tile_rows(rows_total, C, jnp.dtype(y_pred.dtype).itemsize)
    n_tiles = rows_total // tile_rows
    vmem_limit = 64 * 1024 * 1024         # actual working sets stay far below this

    # ---- Kernel 1: streaming prep (NLL, background score, positive partials) ----
    nll, score, psum, pcnt = pl.pallas_call(
        functools.partial(_prep_kernel, num_classes=C),
        out_shape=(
            jax.ShapeDtypeStruct((B, rows_total, LANES), jnp.float32),   # nll
            jax.ShapeDtypeStruct((B, rows_total, LANES), jnp.float32),   # score
            jax.ShapeDtypeStruct((B, n_tiles, 8, LANES), jnp.float32),   # pos_sum
            jax.ShapeDtypeStruct((B, n_tiles, 8, LANES), jnp.int32),     # pos_cnt
        ),
        grid_spec=pltpu.PrefetchScalarGridSpec(
            num_scalar_prefetch=0,
            grid=(B, n_tiles),
            in_specs=[
                pl.BlockSpec((1, tile_rows, LANES), lambda b, t: (b, t, 0)),
                pl.BlockSpec((1, C, tile_rows, LANES), lambda b, t: (b, 0, t, 0)),
            ],
            out_specs=[
                pl.BlockSpec((1, tile_rows, LANES), lambda b, t: (b, t, 0)),
                pl.BlockSpec((1, tile_rows, LANES), lambda b, t: (b, t, 0)),
                pl.BlockSpec((1, 1, 8, LANES), lambda b, t: (b, t, 0, 0)),
                pl.BlockSpec((1, 1, 8, LANES), lambda b, t: (b, t, 0, 0)),
            ],
        ),
        compiler_params=pltpu.CompilerParams(
            dimension_semantics=("parallel", "parallel"),
            vmem_limit_bytes=vmem_limit,
        ),
    )(labels, logits)

    # Per-batch positive counts / num_neg (tiny scalar math in JAX).
    num_pos_b = jnp.sum(pcnt[:, :, 0, 0], axis=1)                     # (B,) int32
    num_neg_b = jnp.minimum(neg_pos * num_pos_b, HW - 1).astype(jnp.int32)

    key_iters = 30                                   # 2^30 > bit pattern of 1.0f
    idx_iters = max(1, (HW - 1).bit_length())        # ceil(log2(HW))

    # ---- Kernel 2: per-batch OHEM negative selection (batch-parallel) ----
    # TODO(synk): for extremely large H*W the whole-row (rows_total,128) blocks
    # here could also be tiled (histogram-based selection); fine for typical maps.
    neg_part = pl.pallas_call(
        functools.partial(_select_kernel, hw=HW,
                          key_iters=key_iters, idx_iters=idx_iters),
        out_shape=jax.ShapeDtypeStruct((B, 2, 8, LANES), jnp.float32),
        grid_spec=pltpu.PrefetchScalarGridSpec(
            num_scalar_prefetch=1,                   # num_neg_b -> SMEM
            grid=(B,),
            in_specs=[
                pl.BlockSpec((1, rows_total, LANES), lambda b, nn: (b, 0, 0)),
                pl.BlockSpec((1, rows_total, LANES), lambda b, nn: (b, 0, 0)),
            ],
            out_specs=pl.BlockSpec((1, 2, 8, LANES), lambda b, nn: (b, 0, 0, 0)),
        ),
        compiler_params=pltpu.CompilerParams(
            dimension_semantics=("parallel",),
            vmem_limit_bytes=vmem_limit,
        ),
    )(num_neg_b, score, nll)

    # Final scalar combine (batch-global means, as in the reference).
    # NOTE: like the PyTorch reference, NaN if there are no positive pixels at
    # all (or no selected negatives) anywhere in the batch.
    pos_sum_total = jnp.sum(psum[:, :, 0, 0])
    pos_cnt_total = jnp.sum(num_pos_b).astype(jnp.float32)
    neg_sum_total = jnp.sum(neg_part[:, 0, 0, 0])
    neg_cnt_total = jnp.sum(neg_part[:, 1, 0, 0])
    ce_pos = pos_sum_total / pos_cnt_total
    ce_neg = neg_sum_total / neg_cnt_total
    return jnp.float32(neg_pos) * ce_pos + ce_neg


def segmentation_ohem_loss_ref(y_true, y_pred, neg_pos=3):
    """Pure-JAX reference mirroring the torch forward (for correctness check)."""
    B, C, H, W = y_pred.shape
    yp = jnp.transpose(y_pred, (0, 2, 3, 1)).astype(jnp.float32)     # (B, H, W, C)
    pos = y_true > 0
    num_pos = jnp.sum(pos.astype(jnp.int32), axis=(1, 2))            # (B,)
    cls_scores = jax.nn.softmax(yp, axis=3)
    loss_c = cls_scores[..., 0].reshape(B, -1)                       # (B, HW)
    loss_idx = jnp.argsort(-loss_c, axis=1)                          # descending
    idx_rank = jnp.argsort(loss_idx, axis=1)
    num_neg = jnp.minimum(neg_pos * num_pos, H * W - 1)
    neg = idx_rank < num_neg[:, None]                                # (B, HW)

    logp = jax.nn.log_softmax(yp, axis=3).reshape(B, H * W, C)
    labels = y_true.reshape(B, H * W).astype(jnp.int32)
    nll = -jnp.take_along_axis(logp, labels[..., None], axis=2)[..., 0]
    posf = pos.reshape(B, H * W).astype(jnp.float32)
    negf = neg.astype(jnp.float32)
    ce_pos = jnp.sum(nll * posf) / jnp.sum(posf)
    ce_neg = jnp.sum(nll * negf) / jnp.sum(negf)
    return neg_pos * ce_pos + ce_neg


if __name__ == "__main__":
    key = jax.random.PRNGKey(0)
    k1, k2 = jax.random.split(key)
    B, C, H, W = 2, 4, 16, 16
    y_pred = jax.random.normal(k1, (B, C, H, W), dtype=jnp.float32)
    y_true = jax.random.randint(k2, (B, H, W), 0, C).astype(jnp.int32)

    loss = segmentation_ohem_loss(y_true, y_pred, neg_pos=3)
    loss = jax.block_until_ready(loss)

    ref = segmentation_ohem_loss_ref(y_true, y_pred, neg_pos=3)
    assert bool(jnp.isfinite(loss)), f"non-finite loss: {loss}"
    assert jnp.allclose(loss, ref, atol=1e-4, rtol=1e-4), (float(loss), float(ref))
    print("KERNEL_OK")
</pallas_src>

<mosaic_0001>
module attributes {stable_mosaic.version = 11 : i64} {
  func.func @_prep_kernel(%arg0: i32, %arg1: i32, %arg2: memref<1x2x128xi32, #tpu.memory_space<vmem>>, %arg3: memref<1x4x2x128xf32, #tpu.memory_space<vmem>>, %arg4: memref<1x2x128xf32, #tpu.memory_space<vmem>>, %arg5: memref<1x2x128xf32, #tpu.memory_space<vmem>>, %arg6: memref<1x1x8x128xf32, #tpu.memory_space<vmem>>, %arg7: memref<1x1x8x128xi32, #tpu.memory_space<vmem>>) attributes {dimension_semantics = [#tpu.dimension_semantics<parallel>, #tpu.dimension_semantics<parallel>], iteration_bounds = array<i64: 2, 1>, scalar_prefetch = 0 : i64, scratch_operands = 0 : i64, tpu.core_type = #tpu.core_type<tc>, window_params = [{transform_indices = @transform_0, window_bounds = array<i64: 1, 2, 128>}, {transform_indices = @transform_1, window_bounds = array<i64: 1, 4, 2, 128>}, {transform_indices = @transform_2, window_bounds = array<i64: 1, 2, 128>}, {transform_indices = @transform_3, window_bounds = array<i64: 1, 2, 128>}, {transform_indices = @transform_4, window_bounds = array<i64: 1, 1, 8, 128>}, {transform_indices = @transform_5, window_bounds = array<i64: 1, 1, 8, 128>}]} {
    %c0 = arith.constant 0 : index
    %c0_0 = arith.constant 0 : index
    %c0_1 = arith.constant 0 : index
    %0 = vector.load %arg2[%c0, %c0_0, %c0_1] : memref<1x2x128xi32, #tpu.memory_space<vmem>>, vector<1x2x128xi32>
    %1 = vector.shape_cast %0 : vector<1x2x128xi32> to vector<2x128xi32>
    %c0_2 = arith.constant 0 : index
    %c0_3 = arith.constant 0 : index
    %c0_4 = arith.constant 0 : index
    %c0_5 = arith.constant 0 : index
    %2 = vector.load %arg3[%c0_2, %c0_3, %c0_4, %c0_5] : memref<1x4x2x128xf32, #tpu.memory_space<vmem>>, vector<1x1x2x128xf32>
    %3 = vector.shape_cast %2 : vector<1x1x2x128xf32> to vector<2x128xf32>
    %c0_6 = arith.constant 0 : index
    %c1 = arith.constant 1 : index
    %c0_7 = arith.constant 0 : index
    %c0_8 = arith.constant 0 : index
    %4 = vector.load %arg3[%c0_6, %c1, %c0_7, %c0_8] : memref<1x4x2x128xf32, #tpu.memory_space<vmem>>, vector<1x1x2x128xf32>
    %5 = vector.shape_cast %4 : vector<1x1x2x128xf32> to vector<2x128xf32>
    %6 = arith.maximumf %3, %5 : vector<2x128xf32>
    %c0_9 = arith.constant 0 : index
    %c2 = arith.constant 2 : index
    %c0_10 = arith.constant 0 : index
    %c0_11 = arith.constant 0 : index
    %7 = vector.load %arg3[%c0_9, %c2, %c0_10, %c0_11] : memref<1x4x2x128xf32, #tpu.memory_space<vmem>>, vector<1x1x2x128xf32>
    %8 = vector.shape_cast %7 : vector<1x1x2x128xf32> to vector<2x128xf32>
    %9 = arith.maximumf %6, %8 : vector<2x128xf32>
    %c0_12 = arith.constant 0 : index
    %c3 = arith.constant 3 : index
    %c0_13 = arith.constant 0 : index
    %c0_14 = arith.constant 0 : index
    %10 = vector.load %arg3[%c0_12, %c3, %c0_13, %c0_14] : memref<1x4x2x128xf32, #tpu.memory_space<vmem>>, vector<1x1x2x128xf32>
    %11 = vector.shape_cast %10 : vector<1x1x2x128xf32> to vector<2x128xf32>
    %12 = arith.maximumf %9, %11 : vector<2x128xf32>
    %13 = arith.subf %3, %12 : vector<2x128xf32>
    %14 = math.exp %13 : vector<2x128xf32>
    %c0_15 = arith.constant 0 : index
    %c1_16 = arith.constant 1 : index
    %c0_17 = arith.constant 0 : index
    %c0_18 = arith.constant 0 : index
    %15 = vector.load %arg3[%c0_15, %c1_16, %c0_17, %c0_18] : memref<1x4x2x128xf32, #tpu.memory_space<vmem>>, vector<1x1x2x128xf32>
    %16 = vector.shape_cast %15 : vector<1x1x2x128xf32> to vector<2x128xf32>
    %17 = arith.subf %16, %12 : vector<2x128xf32>
    %18 = math.exp %17 : vector<2x128xf32>
    %19 = arith.addf %14, %18 : vector<2x128xf32>
    %c1_i32 = arith.constant 1 : i32
    %20 = vector.broadcast %c1_i32 : i32 to vector<2x128xi32>
    %21 = arith.cmpi eq, %1, %20 : vector<2x128xi32>
    %22 = arith.select %21, %16, %3 : vector<2x128xi1>, vector<2x128xf32>
    %c0_19 = arith.constant 0 : index
    %c2_20 = arith.constant 2 : index
    %c0_21 = arith.constant 0 : index
    %c0_22 = arith.constant 0 : index
    %23 = vector.load %arg3[%c0_19, %c2_20, %c0_21, %c0_22] : memref<1x4x2x128xf32, #tpu.memory_space<vmem>>, vector<1x1x2x128xf32>
    %24 = vector.shape_cast %23 : vector<1x1x2x128xf32> to vector<2x128xf32>
    %25 = arith.subf %24, %12 : vector<2x128xf32>
    %26 = math.exp %25 : vector<2x128xf32>
    %27 = arith.addf %19, %26 : vector<2x128xf32>
    %c2_i32 = arith.constant 2 : i32
    %28 = vector.broadcast %c2_i32 : i32 to vector<2x128xi32>
    %29 = arith.cmpi eq, %1, %28 : vector<2x128xi32>
    %30 = arith.select %29, %24, %22 : vector<2x128xi1>, vector<2x128xf32>
    %c0_23 = arith.constant 0 : index
    %c3_24 = arith.constant 3 : index
    %c0_25 = arith.constant 0 : index
    %c0_26 = arith.constant 0 : index
    %31 = vector.load %arg3[%c0_23, %c3_24, %c0_25, %c0_26] : memref<1x4x2x128xf32, #tpu.memory_space<vmem>>, vector<1x1x2x128xf32>
    %32 = vector.shape_cast %31 : vector<1x1x2x128xf32> to vector<2x128xf32>
    %33 = arith.subf %32, %12 : vector<2x128xf32>
    %34 = math.exp %33 : vector<2x128xf32>
    %35 = arith.addf %27, %34 : vector<2x128xf32>
    %c3_i32 = arith.constant 3 : i32
    %36 = vector.broadcast %c3_i32 : i32 to vector<2x128xi32>
    %37 = arith.cmpi eq, %1, %36 : vector<2x128xi32>
    %38 = arith.select %37, %32, %30 : vector<2x128xi1>, vector<2x128xf32>
    %39 = math.log %35 : vector<2x128xf32>
    %40 = arith.subf %38, %12 : vector<2x128xf32>
    %41 = arith.subf %39, %40 : vector<2x128xf32>
    %c0_27 = arith.constant 0 : index
    %c0_28 = arith.constant 0 : index
    %c0_29 = arith.constant 0 : index
    %42 = vector.load %arg4[%c0_27, %c0_28, %c0_29] : memref<1x2x128xf32, #tpu.memory_space<vmem>>, vector<1x2x128xf32>
    %43 = vector.shape_cast %42 : vector<1x2x128xf32> to vector<2x128xf32>
    %44 = vector.shape_cast %41 : vector<2x128xf32> to vector<1x2x128xf32>
    tpu.vector_store %arg4[%c0_27, %c0_28, %c0_29], %44 {strides = array<i32>} : memref<1x2x128xf32, #tpu.memory_space<vmem>>, vector<1x2x128xf32>,
    %45 = arith.divf %14, %35 : vector<2x128xf32>
    %c0_30 = arith.constant 0 : index
    %c0_31 = arith.constant 0 : index
    %c0_32 = arith.constant 0 : index
    %46 = vector.load %arg5[%c0_30, %c0_31, %c0_32] : memref<1x2x128xf32, #tpu.memory_space<vmem>>, vector<1x2x128xf32>
    %47 = vector.shape_cast %46 : vector<1x2x128xf32> to vector<2x128xf32>
    %48 = vector.shape_cast %45 : vector<2x128xf32> to vector<1x2x128xf32>
    tpu.vector_store %arg5[%c0_30, %c0_31, %c0_32], %48 {strides = array<i32>} : memref<1x2x128xf32, #tpu.memory_space<vmem>>, vector<1x2x128xf32>,
    %c0_i32 = arith.constant 0 : i32
    %49 = vector.broadcast %c0_i32 : i32 to vector<2x128xi32>
    %50 = arith.cmpi sgt, %1, %49 : vector<2x128xi32>
    %51 = arith.extui %50 : vector<2x128xi1> to vector<2x128xi32>
    %52 = arith.sitofp %51 : vector<2x128xi32> to vector<2x128xf32>
    %53 = arith.mulf %41, %52 : vector<2x128xf32>
    %54 = vector.shape_cast %53 : vector<2x128xf32> to vector<1x2x128xf32>
    %cst = arith.constant dense<0.000000e+00> : vector<1xf32>
    %55 = vector.multi_reduction <add>, %54, %cst [1, 2] : vector<1x2x128xf32> to vector<1xf32>
    %56 = vector.shape_cast %55 : vector<1xf32> to vector<1x1x1xf32>
    %57 = vector.extract %56[0, 0, 0] : f32 from vector<1x1x1xf32>
    %c0_i32_33 = arith.constant 0 : i32
    %58 = vector.broadcast %c0_i32_33 : i32 to vector<2x128xi32>
    %59 = arith.cmpi sgt, %1, %58 : vector<2x128xi32>
    %60 = arith.extui %59 : vector<2x128xi1> to vector<2x128xi32>
    %61 = vector.shape_cast %60 : vector<2x128xi32> to vector<1x2x128xi32>
    %cst_34 = arith.constant dense<0> : vector<1xi32>
    %62 = vector.multi_reduction <add>, %61, %cst_34 [1, 2] : vector<1x2x128xi32> to vector<1xi32>
    %63 = vector.shape_cast %62 : vector<1xi32> to vector<1x1x1xi32>
    %64 = vector.extract %63[0, 0, 0] : i32 from vector<1x1x1xi32>
    %65 = vector.broadcast %57 : f32 to vector<8x128xf32>
    %c0_35 = arith.constant 0 : index
    %c0_36 = arith.constant 0 : index
    %c0_37 = arith.constant 0 : index
    %c0_38 = arith.constant 0 : index
    %66 = vector.load %arg6[%c0_35, %c0_36, %c0_37, %c0_38] : memref<1x1x8x128xf32, #tpu.memory_space<vmem>>, vector<1x1x8x128xf32>
    %67 = vector.shape_cast %66 : vector<1x1x8x128xf32> to vector<8x128xf32>
    %68 = vector.shape_cast %65 : vector<8x128xf32> to vector<1x1x8x128xf32>
    tpu.vector_store %arg6[%c0_35, %c0_36, %c0_37, %c0_38], %68 {strides = array<i32>} : memref<1x1x8x128xf32, #tpu.memory_space<vmem>>, vector<1x1x8x128xf32>,
    %69 = vector.broadcast %64 : i32 to vector<8x128xi32>
    %c0_39 = arith.constant 0 : index
    %c0_40 = arith.constant 0 : index
    %c0_41 = arith.constant 0 : index
    %c0_42 = arith.constant 0 : index
    %70 = vector.load %arg7[%c0_39, %c0_40, %c0_41, %c0_42] : memref<1x1x8x128xi32, #tpu.memory_space<vmem>>, vector<1x1x8x128xi32>
    %71 = vector.shape_cast %70 : vector<1x1x8x128xi32> to vector<8x128xi32>
    %72 = vector.shape_cast %69 : vector<8x128xi32> to vector<1x1x8x128xi32>
    tpu.vector_store %arg7[%c0_39, %c0_40, %c0_41, %c0_42], %72 {strides = array<i32>} : memref<1x1x8x128xi32, #tpu.memory_space<vmem>>, vector<1x1x8x128xi32>,
    return
  }
  func.func @transform_0(%arg0: i32, %arg1: i32) -> (i32, i32, i32) {
    %c0_i32 = arith.constant 0 : i32
    %c0_i32_0 = arith.constant 0 : i32
    return %arg0, %arg1, %c0_i32 : i32, i32, i32
  }
  func.func @transform_1(%arg0: i32, %arg1: i32) -> (i32, i32, i32, i32) {
    %c0_i32 = arith.constant 0 : i32
    %c0_i32_0 = arith.constant 0 : i32
    %c0_i32_1 = arith.constant 0 : i32
    return %arg0, %c0_i32, %arg1, %c0_i32_0 : i32, i32, i32, i32
  }
  func.func @transform_2(%arg0: i32, %arg1: i32) -> (i32, i32, i32) {
    %c0_i32 = arith.constant 0 : i32
    %c0_i32_0 = arith.constant 0 : i32
    return %arg0, %arg1, %c0_i32 : i32, i32, i32
  }
  func.func @transform_3(%arg0: i32, %arg1: i32) -> (i32, i32, i32) {
    %c0_i32 = arith.constant 0 : i32
    %c0_i32_0 = arith.constant 0 : i32
    return %arg0, %arg1, %c0_i32 : i32, i32, i32
  }
  func.func @transform_4(%arg0: i32, %arg1: i32) -> (i32, i32, i32, i32) {
    %c0_i32 = arith.constant 0 : i32
    %c0_i32_0 = arith.constant 0 : i32
    %c0_i32_1 = arith.constant 0 : i32
    return %arg0, %arg1, %c0_i32, %c0_i32_0 : i32, i32, i32, i32
  }
  func.func @transform_5(%arg0: i32, %arg1: i32) -> (i32, i32, i32, i32) {
    %c0_i32 = arith.constant 0 : i32
    %c0_i32_0 = arith.constant 0 : i32
    %c0_i32_1 = arith.constant 0 : i32
    return %arg0, %arg1, %c0_i32, %c0_i32_0 : i32, i32, i32, i32
  }
}

</mosaic_0001>

<bundles_post_ra>
// kernel: tpu_custom_call.1
= control target key start
LH: loop header
LB: loop body
LE: loop exit
PB: predicated region body
PF: predicated region fallthrough
CT: control target
= control target key end

     0   :  { %s1427_s0 = inlined_call_operand.hbm [shape: s32[2,2,128], index: 0, kind: input, shape index: {}]   ;;  %s1428_s1 = inlined_call_operand.hbm [shape: f32[2,4,2,128], index: 1, kind: input, shape index: {}]   ;;  %s1429_s2 = inlined_call_operand.hbm [shape: f32[2,2,128], index: 2, kind: output, shape index: {0}]   ;;  %s1430_s3 = inlined_call_operand.hbm [shape: f32[2,2,128], index: 3, kind: output, shape index: {1}]   ;;  %s1431_s4 = inlined_call_operand.hbm [shape: f32[2,1,8,128], index: 4, kind: output, shape index: {2}]   ;;  %s1432_s5 = inlined_call_operand.hbm [shape: s32[2,1,8,128], index: 5, kind: output, shape index: {3}]  }
   0x1   :  { %1436 = sst [smem:[#allocation18_spill]] %s1427_s0 }
   0x2   :  { %11 = vsyncpa [#allocation3], 0 }
   0x3   :  { %13 = vsyncpa [#allocation3 + $0x1], 0 }
   0x4   :  { %14 = vsyncpa [#allocation6], 0 }
   0x5   :  { %16 = vsyncpa [#allocation6 + $0x1], 0 }
   0x6   :  { %17 = vsyncpa [#allocation4], 0 }
   0x7   :  { %19 = vsyncpa [#allocation4 + $0x1], 0 }
   0x8   :  { %20 = vsyncpa [#allocation9], 0 }
   0x9   :  { %22 = vsyncpa [#allocation9 + $0x1], 0 }
   0xa   :  { %23 = vsyncpa [#allocation12], 0 }
   0xb   :  { %25 = vsyncpa [#allocation12 + $0x1], 0  ;;  %s1099_s18 = smov 0   ;;  %s1101_s19 = smov 0  }
   0xc   :  { %s1103_s20 = smov 0   ;;  %s1105_s21 = smov 0  }
   0xd   :  { %s1107_s22 = smov 0   ;;  %s1109_s23 = smov 0  }
   0xe LB: > { %s1130_s24 = sadd.s32 4294967295, %s1057_s23   ;;  %s1434_s25 = sadd.s32 4294967294, %s1057_s23   ;;  %s1057_s23 = sphi %s1109_s23, %s31_s23   ;;  %s1053_s22 = sphi %s1107_s22, %s1455_s22   ;;  %s1049_s21 = sphi %s1105_s21, %s1454_s21   ;;  %s1045_s20 = sphi %s1103_s20, %s1453_s20   ;;  %s1041_s19 = sphi %s1101_s19, %s1452_s19   ;;  %s1037_s18 = sphi %s1099_s18, %s1451_s18  }
   0xf   : > { %s43_s26 = sadd.s32 1, %s1053_s22  ;;  %s52_s27 = sadd.s32 1, %s1045_s20 }
  0x10   : > { %p45_p0 = scmp.ge.s32.totalorder %s43_s26, 2  ;;  %p59_p1 = scmp.ne.s32.totalorder %s1045_s20, %s1041_s19 }
  0x11   : > { %p60_p2 = scmp.eq.s32.totalorder %s1057_s23, 0  ;;  %p65_p3 = scmp.ne.s32.totalorder %s1041_s19, %s1037_s18 }
  0x12   : > { %s1457_s26 = smov (%p45_p0, %s43_s26), 0  ;;  %p66_p5 = scmp.eq.s32.totalorder %s1130_s24, 0 }
  0x13   : > { %p1142_p4 = por %p60_p2, %p59_p1  ;;  %s47_s29 = ssub.s32 %s1053_s22, %s1457_s26 }
  0x14   : > { %p119_p6 = scmp.eq.s32.totalorder %s1130_s24, 1  ;;  %p50_p7 = scmp.eq.s32.totalorder %s47_s29, 0 }
  0x15   : > { %p1150_p8 = por %p66_p5, %p65_p3  ;;  %p125_p10 = scmp.eq.s32.totalorder %s1434_s25, 1 }
  0x16   : > { %p1154_p9 = por %p119_p6, %p59_p1  ;;  %p753_p13 = scmp.lt.s32.totalorder %s1057_s23, 2 }
  0x17   : > { %s1438_s30 = scalar_select %p1150_p8, 1, 0 }
  0x18   : > { %s1439_s6 = scalar_select %p1154_p9, 1, 0 }
  0x19   : > { %s1161_s7 = scalar_select %p50_p7, %s1045_s20, %s52_s27  }
  0x1a   : > { %p1163_p11 = por %p125_p10, %p65_p3  ;;  %s1170_s9 = sand.u32 1, %s1045_s20  }
  0x1b   : > { %s690_s10 = sshll.u32 %s1170_s9, 1  ;;  %s691_s11 = sshll.u32 %s1053_s22, 5 }
  0x1c   : > { %s1440_s8 = scalar_select %p1163_p11, 1, 0 }
  0x1d   : > { %s1441_s0 = sld [smem:[#allocation18_spill]]  ;;  %s233_s15 = scalar_lea.vmem [#allocation2], %s690_s10 }
  0x1e   : > { %s241_s16 = sshll.u32 %s233_s15, 4  ;;  %p1183_p0 = pnand %p753_p13, %p1142_p4  ;;  %s1179_s16 = int_to_ptr.vmem [resolvable:$true] %s241_s16 }
  0x1f   : > { %s230_s27 = scalar_lea.sflag [#allocation3], %s1170_s9 }
  0x20   : > { %p821_p5 = pneg %p1183_p0 }
  0x23   : > { %s1177_s14 = scalar_lea.hbm %s1441_s0, %s691_s11  ;;  %s824_s28 = scalar_lea.hbm %s1441_s0, 64 }
  0x24   : > { %s819_s29 = scalar_lea.hbm %s1177_s14, 32  ;;  %p825_p4 = scmp.lt.u32.totalorder %s1177_s14, %s1441_s0 }
  0x25   : > { %p820_p3 = scmp.ne.s32.totalorder %s1177_s14, %s819_s29  ;;  %p826_p10 = scmp.lt.u32.totalorder %s824_s28, %s819_s29 }
  0x26   : > { %p828_p12 = scmp.lt.u32.totalorder %s819_s29, %s1177_s14 }
  0x27   : > { %p822_p6 = pnand %p821_p5, %p820_p3  ;;  %p827_p13 = por %p826_p10, %p825_p4 }
  0x29   : > { %p823_p7 = pneg %p822_p6  ;;  %p829_p1 = por %p828_p12, %p827_p13 }
  0x2b   : > { %p830_p2 = pnand %p829_p1, %p823_p7 }
  0x2d   : > { %833 = shalt.err (!%p830_p2)
}
  0x2e   : > { %s834_s15 = scalar_lea.vmem %s1179_s16, 32  ;;  %s1059_s10 = smov [#allocation2]  }
  0x2f   : > { %p835_p3 = scmp.ne.s32.totalorder %s1179_s16, %s834_s15  ;;  %s839_s11 = sshll.u32 %s1059_s10, 4  ;;  %s840_s11 = int_to_ptr.vmem [resolvable:$false] %s839_s11 }
  0x30   : > { %s841_s12 = scalar_lea.vmem %s840_s11, 64  ;;  %p842_p9 = scmp.lt.s32.totalorder %s1179_s16, %s840_s11 }
  0x31   : > { %p837_p6 = pnand %p835_p3, %p821_p5  ;;  %p843_p4 = scmp.lt.s32.totalorder %s841_s12, %s834_s15 }
  0x33   : > { %p838_p11 = pneg %p837_p6  ;;  %p844_p10 = por %p843_p4, %p842_p9 }
  0x35   : > { %p845_p12 = pnand %p844_p10, %p838_p11 }
  0x37   : > { %848 = shalt.err (!%p845_p12)
}
  0x38   : > { %736 = dma.hbm_to_vmem [thread:$0]  (!%p1183_p0), %s1177_s14, 32, %s1179_s16, %s230_s27  }
  0x39   : > { %p1443_p1 = scmp.lt.s32.totalorder %s1057_s23, 3  ;;  %p1444_p2 = scmp.ge.s32.totalorder %s1057_s23, 1 }
  0x3a   : > { %s692_s28 = sshll.u32 %s1170_s9, 3  ;;  %s716_s13 = sshll.u32 %s1053_s22, 7 }
  0x3b   : > { %p1219_p7 = pnand %p1444_p2, %p1443_p1  ;;  %s1228_s11 = scalar_lea.hbm %s1428_s1, %s716_s13 }
  0x3c   : > { %s252_s12 = scalar_lea.vmem [#allocation5], %s692_s28  ;;  %s249_s14 = scalar_lea.sflag [#allocation6], %s1170_s9 }
  0x3d   : > { %s260_s25 = sshll.u32 %s252_s12, 4  ;;  %s849_s16 = scalar_lea.hbm %s1228_s11, 128  ;;  %s1230_s25 = int_to_ptr.vmem [resolvable:$true] %s260_s25 }
  0x3e   : > { %p850_p9 = scmp.ne.s32.totalorder %s1228_s11, %s849_s16  ;;  %s854_s13 = scalar_lea.hbm %s1428_s1, 256 }
  0x3f   : > { %p855_p3 = scmp.lt.u32.totalorder %s1228_s11, %s1428_s1  ;;  %p856_p6 = scmp.lt.u32.totalorder %s854_s13, %s849_s16 }
  0x40   : > { %p852_p11 = pnand %p850_p9, %p821_p5  ;;  %p858_p10 = scmp.lt.u32.totalorder %s849_s16, %s1228_s11 }
  0x41   : > { %p857_p4 = por %p856_p6, %p855_p3 }
  0x42   : > { %p853_p13 = pneg %p852_p11 }
  0x43   : > { %p859_p12 = por %p858_p10, %p857_p4 }
  0x45   : > { %p860_p1 = pnand %p859_p12, %p853_p13 }
  0x47   : > { %863 = shalt.err (!%p860_p1)
}
  0x48   : > { %s864_s28 = scalar_lea.vmem %s1230_s25, 128  ;;  %s1060_s0 = smov [#allocation5]  }
  0x49   : > { %p865_p2 = scmp.ne.s32.totalorder %s1230_s25, %s864_s28  ;;  %s869_s12 = sshll.u32 %s1060_s0, 4  ;;  %s870_s12 = int_to_ptr.vmem [resolvable:$false] %s869_s12 }
  0x4a   : > { %s871_s27 = scalar_lea.vmem %s870_s12, 256  ;;  %p872_p8 = scmp.lt.s32.totalorder %s1230_s25, %s870_s12 }
  0x4b   : > { %p867_p9 = pnand %p865_p2, %p821_p5  ;;  %p873_p3 = scmp.lt.s32.totalorder %s871_s27, %s864_s28 }
  0x4d   : > { %p868_p11 = pneg %p867_p9  ;;  %p874_p6 = por %p873_p3, %p872_p8 }
  0x4f   : > { %p875_p4 = pnand %p874_p6, %p868_p11 }
  0x51   : > { %878 = shalt.err (!%p875_p4)
}
  0x52   : > { %s1061_s16 = smov 32   ;;  %s1062_s13 = smov 2  }
  0x53   : > { %739 = dma.hbm_to_vmem [thread:$0]  (!%p1183_p0), %s1228_s11, 128, %s1230_s25, %s249_s14, %s1061_s16, %s1061_s16, %s1062_s13  }
  0x54   : > { %272 = sbr.rel (%p1219_p7) target bundleno = 386 (0x182), region = 28  ;;  %s1261_s15 = sand.u32 (!%p1219_p7), 1, %s1041_s19  }
  0x55   : > { %s1264_s10 = sshll.u32 (!%p1219_p7), %s1261_s15, 1  ;;  %s275_s28 = scalar_lea.sflag (!%p1219_p7), [#allocation3], %s1261_s15 }
  0x56   : > { %s278_s0 = scalar_lea.vmem (!%p1219_p7), [#allocation2], %s1264_s10  ;;  %p1446_p8 = scmp.ne.s32.totalorder (!%p1219_p7), %s1438_s30, 0 }
  0x5b   : > { %1016 = dma.done.wait (%p1446_p8), %s275_s28, 32  }
  0x5c   : > { %1018 = vsyncadd (%p1446_p8), %s275_s28, 4294967264  ;;  %s1273_s25 = sshll.u32 %s1261_s15, 3  ;;  %s284_s9 = scalar_lea.sflag [#allocation6], %s1261_s15 }
  0x5d   : > { %s287_s17 = scalar_lea.vmem [#allocation5], %s1273_s25 }
  0x5e   : > { %1020 = dma.done.wait (%p1446_p8), %s284_s9, 128  }
  0x5f   : > { %1022 = vsyncadd (%p1446_p8), %s284_s9, 4294967168  ;;  %vm378_vm0 = vcmask 1041408   ;;  %v334_v0 = vld [vmem:[%s278_s0] sm:$0x3]  ;;  %v335_v1 = vld [vmem:[%s287_s17] sm:$0x3] }
  0x60   : > { %v702_v2 = vld [vmem:[%s287_s17 + $0x2] sm:$0x3]  ;;  %vm374_vm1 = vcmp.gt.s32.totalorder %v334_v0, 0  ;;  %v703_v4 = vld [vmem:[%s287_s17 + $0x4] sm:$0x3]  ;;  %v1063_v5 = vmov 0  }
  0x61   : > { %v338_v3 = vmax.f32 %v335_v1, %v702_v2  ;;  %v375_v6 = vsel %vm374_vm1, 1, %v1063_v5  ;;  %v704_v7 = vld [vmem:[%s287_s17 + $0x6] sm:$0x3]  ;;  %vm352_vm2 = vcmp.eq.s32.totalorder %v334_v0, 1  ;;  %vm358_vm3 = vcmp.eq.s32.totalorder %v334_v0, 2  ;;  %s418_s30 = sand.u32 1, %s1130_s24  }
  0x62   : > { %v389_v8 = vsel %vm378_vm0, %v375_v6, 0  ;;  %v353_v30 = vsel %vm352_vm2, %v702_v2, %v335_v1  ;;  %vm364_vm4 = vcmp.eq.s32.totalorder %v334_v0, 3  ;;  %v1064_v36 = vmov 0.0   ;;  %s319_s29 = scalar_lea.vmem [#allocation8], %s1264_s10  ;;  %s710_s11 = sshll.u32 %s1049_s21, 5 }
  0x63   : > { %v341_v9 = vmax.f32 %v338_v3, %v703_v4  ;;  %v391_v10 = vshrl.u32 %v389_v8, 16  ;;  %v390_v11 = vand.u32 65535, %v389_v8  ;;  %v359_v31 = vsel %vm358_vm3, %v703_v4, %v353_v30  ;;  %s1293_s27 = scalar_lea.hbm %s1430_s3, %s710_s11  ;;  %s457_s16 = sshll.u32 %s319_s29, 4  ;;  %s458_s16 = int_to_ptr.vmem [resolvable:$true] %s457_s16 }
  0x64   : > { %v365_v32 = vsel %vm364_vm4, %v704_v7, %v359_v31  ;;  %v705_v37 = vsel %vm374_vm1, 1.0, %v1064_v36  ;;  %s1295_s13 = scalar_lea.sflag [#allocation9], %s418_s30  ;;  %s879_s28 = scalar_lea.vmem %s458_s16, 32 }
  0x65   : > { %v344_v12 = vmax.f32 %v341_v9, %v704_v7  ;;  %v393_v13 = vcvt.s32.f32 %v391_v10  ;;  %v392_v18 = vcvt.s32.f32 %v390_v11  ;;  %p880_p0 = scmp.ne.s32.totalorder %s458_s16, %s879_s28  ;;  %p1447_p5 = scmp.ne.s32.totalorder %s1439_s6, 0 }
  0x66   : > { %s1065_s0 = smov [#allocation8]  }
  0x67   : > { %v345_v14 = vsub.f32 %v335_v1, %v344_v12  ;;  %v348_v15 = vsub.f32 %v702_v2, %v344_v12  ;;  %v354_v16 = vsub.f32 %v703_v4, %v344_v12  ;;  %v360_v17 = vsub.f32 %v704_v7, %v344_v12  ;;  %396 = vadd.xlane.f32.xlu0 %v393_v13  ;;  %p881_p7 = pnand %p880_p0, %p1447_p5  ;;  %s883_s24 = sshll.u32 %s1065_s0, 4  ;;  %s884_s24 = int_to_ptr.vmem [resolvable:$false] %s883_s24 }
  0x68   : > { %v368_v33 = vsub.f32 %v365_v32, %v344_v12  ;;  %s885_s9 = scalar_lea.vmem %s884_s24, 64  ;;  %p886_p10 = scmp.lt.s32.totalorder %s458_s16, %s884_s24 }
  0x69   : > { %v346_v19 = vmul.f32 1.442695, %v345_v14  ;;  %v349_v20 = vmul.f32 1.442695, %v348_v15  ;;  %v355_v21 = vmul.f32 1.442695, %v354_v16  ;;  %p882_p13 = pneg %p881_p7  ;;  %p887_p12 = scmp.lt.s32.totalorder %s885_s9, %s879_s28 }
  0x6a   : > { %v361_v22 = vmul.f32 1.442695, %v360_v17 }
  0x6b   : > { %807 = vpow2.f32 %v346_v19  ;;  %394 = vadd.xlane.f32.xlu0 %v392_v18  ;;  %p888_p1 = por %p887_p12, %p886_p10 }
  0x6c   : > { %809 = vpow2.f32 %v349_v20 }
  0x6d   : > { %811 = vpow2.f32 %v355_v21  ;;  %p889_p2 = pnand %p888_p1, %p882_p13 }
  0x6e   : > { %813 = vpow2.f32 %v361_v22 }
  0x75   : > { %v808_v23 = vpop.eup %807 }
  0x76   : > { %v810_v24 = vpop.eup %809 }
  0x77   : > { %v812_v25 = vpop.eup %811  ;;  %v351_v26 = vadd.f32 %v810_v24, %v808_v23 }
  0x78   : > { %v814_v27 = vpop.eup %813 }
  0x79   : > { %v357_v28 = vadd.f32 %v812_v25, %v351_v26 }
  0x7b   : > { %v363_v29 = vadd.f32 %v814_v27, %v357_v28 }
  0x7d   : > { %815 = vlog2.f32 %v363_v29 }
  0x7e   : > { %817 = vrcp.f32 %v363_v29 }
  0x87   : > { %v816_v34 = vpop.eup %815 }
  0x88   : > { %v367_v35 = vmul.f32 0.6931472, %v816_v34  ;;  %v818_v41 = vpop.eup %817 }
  0x89   : > { %v372_v42 = vmul.f32 %v818_v41, %v808_v23 }
  0x8a   : > { %v369_v38 = vsub.f32 %v367_v35, %v368_v33 }
  0x8b   : > { %373 = vst [vmem:[%s319_s29] sm:$0x3] %v372_v42 }
  0x8c   : > { %v377_v39 = vmul.f32 %v705_v37, %v369_v38 }
  0x8e   : > { %v379_v40 = vsel %vm378_vm0, %v377_v39, 0.0 }
  0x8f   : > { %380 = vadd.xlane.f32.xlu1 %v379_v40 }
  0x90   : > { %892 = shalt.err (!%p889_p2)
}
  0x91   : > { %s893_s17 = scalar_lea.hbm %s1293_s27, 32  ;;  %s897_s14 = scalar_lea.hbm %s1430_s3, 64 }
  0x92   : > { %p894_p9 = scmp.ne.s32.totalorder %s1293_s27, %s893_s17  ;;  %p898_p6 = scmp.lt.u32.totalorder %s1293_s27, %s1430_s3 }
  0x93   : > { %p899_p4 = scmp.lt.u32.totalorder %s897_s14, %s893_s17  ;;  %p901_p0 = scmp.lt.u32.totalorder %s893_s17, %s1293_s27 }
  0x94   : > { %p895_p11 = pnand %p894_p9, %p1447_p5 }
  0x95   : > { %p900_p8 = por %p899_p4, %p898_p6 }
  0x96   : > { %p896_p3 = pneg %p895_p11 }
  0x97   : > { %p902_p7 = por %p901_p0, %p900_p8 }
  0x99   : > { %p903_p13 = pnand %p902_p7, %p896_p3 }
  0x9b   : > { %906 = shalt.err (!%p903_p13)
}
  0x9c   : > { %726 = dma.vmem_to_hbm [thread:$0]  (%p1447_p5), %s458_s16, 32, %s1293_s27, %s1295_s13  }
  0x9d   : > { %s312_s28 = scalar_lea.vmem [#allocation7], %s1264_s10  ;;  %s1321_s30 = scalar_lea.hbm %s1429_s2, %s710_s11 }
  0x9e   : > { %370 = vst [vmem:[%s312_s28] sm:$0x3] %v369_v38  ;;  %s443_s17 = sshll.u32 %s312_s28, 4  ;;  %s414_s29 = scalar_lea.sflag [#allocation4], %s1261_s15  ;;  %s444_s17 = int_to_ptr.vmem [resolvable:$true] %s443_s17 }
  0x9f   : > { %s907_s14 = scalar_lea.vmem %s444_s17, 32  ;;  %s1066_s12 = smov [#allocation7]  }
  0xa0   : > { %p908_p10 = scmp.ne.s32.totalorder %s444_s17, %s907_s14  ;;  %s911_s0 = sshll.u32 %s1066_s12, 4  ;;  %s912_s0 = int_to_ptr.vmem [resolvable:$false] %s911_s0 }
  0xa1   : > { %s913_s27 = scalar_lea.vmem %s912_s0, 64  ;;  %p914_p2 = scmp.lt.s32.totalorder %s444_s17, %s912_s0 }
  0xa2   : > { %p909_p12 = pnand %p908_p10, %p1447_p5  ;;  %p915_p9 = scmp.lt.s32.totalorder %s913_s27, %s907_s14 }
  0xa4   : > { %p910_p1 = pneg %p909_p12  ;;  %p916_p11 = por %p915_p9, %p914_p2 }
  0xa6   : > { %p917_p3 = pnand %p916_p11, %p910_p1 }
  0xa8   : > { %920 = shalt.err (!%p917_p3)
}
  0xa9   : > { %s921_s10 = scalar_lea.hbm %s1321_s30, 32  ;;  %s925_s28 = scalar_lea.hbm %s1429_s2, 64 }
  0xaa   : > { %p922_p6 = scmp.ne.s32.totalorder %s1321_s30, %s921_s10  ;;  %p926_p0 = scmp.lt.u32.totalorder %s1321_s30, %s1429_s2 }
  0xab   : > { %p927_p7 = scmp.lt.u32.totalorder %s925_s28, %s921_s10  ;;  %p929_p10 = scmp.lt.u32.totalorder %s921_s10, %s1321_s30 }
  0xac   : > { %p923_p4 = pnand %p922_p6, %p1447_p5 }
  0xad   : > { %p928_p13 = por %p927_p7, %p926_p0 }
  0xae   : > { %p924_p8 = pneg %p923_p4 }
  0xaf   : > { %p930_p12 = por %p929_p10, %p928_p13 }
  0xb1   : > { %p931_p1 = pnand %p930_p12, %p924_p8 }
  0xb3   : > { %934 = shalt.err (!%p931_p1)
}
  0xb4   : > { %725 = dma.vmem_to_hbm [thread:$0]  (%p1447_p5), %s444_s17, 32, %s1321_s30, %s414_s29  }
  0xb5   : > { %s326_s30 = scalar_lea.vmem [#allocation10], %s1273_s25  ;;  %s333_s29 = scalar_lea.vmem [#allocation11], %s1273_s25 }
  0xb6   : > { %s471_s17 = sshll.u32 %s326_s30, 4  ;;  %s485_s14 = sshll.u32 %s333_s29, 4  ;;  %s1344_s17 = int_to_ptr.vmem [resolvable:$true] %s471_s17  ;;  %s1346_s14 = int_to_ptr.vmem [resolvable:$true] %s485_s14 }
  0xb7   : > { %s712_s12 = sshll.u32 %s1049_s21, 7  ;;  %s935_s21 = scalar_lea.vmem %s1344_s17, 128 }
  0xb8   : > { %s1351_s10 = scalar_lea.hbm %s1431_s4, %s712_s12  ;;  %s1356_s25 = scalar_lea.hbm %s1432_s5, %s712_s12 }
  0xb9   : > { %p936_p2 = scmp.ne.s32.totalorder %s1344_s17, %s935_s21  ;;  %s1067_s9 = smov [#allocation10]  }
  0xba   : > { %s939_s0 = sshll.u32 %s1067_s9, 4  ;;  %s940_s0 = int_to_ptr.vmem [resolvable:$false] %s939_s0 }
  0xbb   : > { %p937_p9 = pnand %p936_p2, %p1447_p5  ;;  %s941_s27 = scalar_lea.vmem %s940_s0, 256 }
  0xbc   : > { %p942_p3 = scmp.lt.s32.totalorder %s1344_s17, %s940_s0  ;;  %p943_p6 = scmp.lt.s32.totalorder %s941_s27, %s935_s21 }
  0xbd   : > { %p938_p11 = pneg %p937_p9 }
  0xbe   : > { %p944_p4 = por %p943_p6, %p942_p3 }
  0xc0   : > { %p945_p8 = pnand %p944_p4, %p938_p11 }
  0xf4   : > { %v397_v43 = vpop.xlane.xlu0 %396 }
  0xf5   : > { %v399_v44 = vcvt.f32.s32 %v397_v43 }
  0xf7   : > { %v400_v46 = vshll.u32 %v399_v44, 16 }
  0xf8   : > { %v395_v45 = vpop.xlane.xlu0 %394 }
  0xf9   : > { %v398_v47 = vcvt.f32.s32 %v395_v45 }
  0xfb   : > { %v401_v48 = vadd.s32 %v400_v46, %v398_v47 }
  0xfd   : > { %v402_v49 = vrot.slane %v401_v48, 4 }
  0xff   : > { %v403_v50 = vadd.s32 %v402_v49, %v401_v48 }
 0x101   : > { %v404_v52 = vrot.slane %v403_v50, 2 }
 0x103   : > { %v405_v55 = vadd.s32 %v404_v52, %v403_v50 }
 0x105   : > { %v406_v58 = vrot.slane %v405_v55, 1 }
 0x107   : > { %v407_v61 = vadd.s32 %v406_v58, %v405_v55 }
 0x11c   : > { %v381_v51 = vpop.xlane.xlu1 %380 }
 0x11d   : > { %v382_v53 = vrot.slane %v381_v51, 4 }
 0x11f   : > { %v383_v54 = vadd.f32 %v382_v53, %v381_v51 }
 0x121   : > { %v384_v56 = vrot.slane %v383_v54, 2 }
 0x123   : > { %v385_v57 = vadd.f32 %v384_v56, %v383_v54 }
 0x125   : > { %v386_v59 = vrot.slane %v385_v57, 1 }
 0x127   : > { %v387_v60 = vadd.f32 %v386_v59, %v385_v57 }
 0x129   : > { %717 = vpush %v387_v60 }
 0x12a   : > { %719 = vpush %v407_v61 }
 0x15a   : > { %s718_s11 = spop %717 }
 0x15b   : > { %v409_v62 = vstv %s718_s11  ;;  %s720_s16 = spop %719 }
 0x15c   : > { %410 = vst [vmem:[%s326_s30] sm:$0xff] %v409_v62  ;;  %v411_v63 = vstv %s720_s16 }
 0x15d   : > { %412 = vst [vmem:[%s333_s29] sm:$0xff] %v411_v63 }
 0x15e   : > { %948 = shalt.err (!%p945_p8)
}
 0x15f   : > { %s949_s30 = scalar_lea.hbm %s1351_s10, 128  ;;  %s953_s11 = scalar_lea.hbm %s1431_s4, 256 }
 0x160   : > { %p950_p0 = scmp.ne.s32.totalorder %s1351_s10, %s949_s30  ;;  %p954_p10 = scmp.lt.u32.totalorder %s1351_s10, %s1431_s4 }
 0x161   : > { %p955_p12 = scmp.lt.u32.totalorder %s953_s11, %s949_s30  ;;  %p957_p2 = scmp.lt.u32.totalorder %s949_s30, %s1351_s10 }
 0x162   : > { %p951_p7 = pnand %p950_p0, %p1447_p5 }
 0x163   : > { %p956_p1 = por %p955_p12, %p954_p10 }
 0x164   : > { %p952_p13 = pneg %p951_p7 }
 0x165   : > { %p958_p9 = por %p957_p2, %p956_p1 }
 0x167   : > { %p959_p11 = pnand %p958_p9, %p952_p13 }
 0x169   : > { %962 = shalt.err (!%p959_p11)
}
 0x16a   : > { %727 = dma.vmem_to_hbm [thread:$0]  (%p1447_p5), %s1344_s17, 128, %s1351_s10, %s1295_s13  }
 0x16b   : > { %s429_s24 = scalar_lea.sflag [#allocation12], %s1261_s15  ;;  %s963_s21 = scalar_lea.vmem %s1346_s14, 128 }
 0x16c   : > { %p964_p3 = scmp.ne.s32.totalorder %s1346_s14, %s963_s21  ;;  %s1068_s9 = smov [#allocation11]  }
 0x16d   : > { %s967_s0 = sshll.u32 %s1068_s9, 4  ;;  %s968_s0 = int_to_ptr.vmem [resolvable:$false] %s967_s0 }
 0x16e   : > { %p965_p6 = pnand %p964_p3, %p1447_p5  ;;  %s969_s27 = scalar_lea.vmem %s968_s0, 256 }
 0x16f   : > { %p970_p8 = scmp.lt.s32.totalorder %s1346_s14, %s968_s0  ;;  %p971_p0 = scmp.lt.s32.totalorder %s969_s27, %s963_s21 }
 0x170   : > { %p966_p4 = pneg %p965_p6 }
 0x171   : > { %p972_p7 = por %p971_p0, %p970_p8 }
 0x173   : > { %p973_p13 = pnand %p972_p7, %p966_p4 }
 0x175   : > { %976 = shalt.err (!%p973_p13)
}
 0x176   : > { %s977_s15 = scalar_lea.hbm %s1356_s25, 128  ;;  %s981_s10 = scalar_lea.hbm %s1432_s5, 256 }
 0x177   : > { %p978_p10 = scmp.ne.s32.totalorder %s1356_s25, %s977_s15  ;;  %p982_p2 = scmp.lt.u32.totalorder %s1356_s25, %s1432_s5 }
 0x178   : > { %p983_p9 = scmp.lt.u32.totalorder %s981_s10, %s977_s15  ;;  %p985_p3 = scmp.lt.u32.totalorder %s977_s15, %s1356_s25 }
 0x179   : > { %p979_p12 = pnand %p978_p10, %p1447_p5 }
 0x17a   : > { %p984_p11 = por %p983_p9, %p982_p2 }
 0x17b   : > { %p980_p1 = pneg %p979_p12 }
 0x17c   : > { %p986_p6 = por %p985_p3, %p984_p11 }
 0x17e   : > { %p987_p4 = pnand %p986_p6, %p980_p1 }
 0x180   : > { %990 = shalt.err (!%p987_p4)
}
 0x181   : > { %728 = dma.vmem_to_hbm [thread:$0]  (%p1447_p5), %s1346_s14, 128, %s1356_s25, %s429_s24  }
 0x182 PF: > { %s497_s12 = sand.u32 1, %s1037_s18   ;;  %p1448_p8 = scmp.ne.s32.totalorder %s1440_s8, 0 }
 0x183   : > { %p1449_p0 = scmp.ge.s32.totalorder %s1057_s23, 2  ;;  %s498_s11 = scalar_lea.sflag [#allocation4], %s497_s12 }
 0x185   : > { %p741_p7 = pnand %p1449_p0, %p1448_p8 }
 0x187   : > { %1024 = dma.done.wait (!%p741_p7), %s498_s11, 32  }
 0x188   : > { %1026 = vsyncadd (!%p741_p7), %s498_s11, 4294967264  ;;  %s1450_s16 = sadd.s32 4294967294, %s1057_s23  }
 0x189   : > { %s506_s28 = sand.u32 1, %s1450_s16  }
 0x18a   : > { %s507_s21 = scalar_lea.sflag [#allocation9], %s506_s28 }
 0x18b   : > { %1028 = dma.done.wait (!%p741_p7), %s507_s21, 160  }
 0x18c   : > { %1030 = vsyncadd (!%p741_p7), %s507_s21, 4294967136  ;;  %s525_s6 = scalar_lea.sflag [#allocation12], %s497_s12 }
 0x18d   : > { %1032 = dma.done.wait (!%p741_p7), %s525_s6, 128  }
 0x18e   : > { %1034 = vsyncadd (!%p741_p7), %s525_s6, 4294967168  ;;  %s31_s23 = sadd.s32 1, %s1057_s23   ;;  %s1451_s18 = smov %s1041_s19 }
 0x18f   : > { %p28_p5 = scmp.ge.s32.totalorder %s31_s23, 4   ;;  %s1452_s19 = smov %s1045_s20 }
 0x190   : > { %s1453_s20 = smov %s1161_s7  ;;  %s1454_s21 = smov %s1053_s22 }
 0x191   : > { %s1455_s22 = smov %s1457_s26  ;;  %30 = sbr.rel (!%p28_p5) target bundleno = 14 (0xe), region = 138 }
 0x198   :  { %530 = vsyncpa [#allocation3], 1 }
 0x199   :  { %532 = vsyncpa [#allocation3 + $0x1], 1 }
 0x19a   :  { %533 = vsyncpa [#allocation6], 1 }
 0x19b   :  { %535 = vsyncpa [#allocation6 + $0x1], 1 }
 0x19c   :  { %536 = vsyncpa [#allocation4], 1 }
 0x19d   :  { %538 = vsyncpa [#allocation4 + $0x1], 1 }
 0x19e   :  { %539 = vsyncpa [#allocation9], 1 }
 0x19f   :  { %541 = vsyncpa [#allocation9 + $0x1], 1 }
 0x1a0   :  { %542 = vsyncpa [#allocation12], 1 }
 0x1a1   :  { %544 = vsyncpa [#allocation12 + $0x1], 1 }

</bundles_post_ra>
